<compile_context>
chip_gen: v5e
topology: v5e:2x2
jax: 0.10.0
libtpu: 0.0.40
codegen_flags: <defaults>
</compile_context>

<pallas_src>
import functools
import math

import numpy as np
import jax
import jax.numpy as jnp
from jax.experimental import pallas as pl
from jax.experimental.pallas import tpu as pltpu

# ----------------------------------------------------------------------------
# Pallas kernels
# ----------------------------------------------------------------------------

_SELU_ALPHA = 1.6732632423543772
_SELU_SCALE = 1.0507009873554805
_TM_CAP = 1024          # max row tile (sweep target for v5e/v6e; >=4 steps on main shapes)
_BN_EPS = 1e-5


def _apply_act(y, act):
    if act == "none":
        return y
    if act == "relu":
        return jnp.maximum(y, 0.0)
    if act == "relu6":
        return jnp.clip(y, 0.0, 6.0)
    if act == "sigmoid":
        # stable sigmoid on the EUP (tanh) instead of 1/(1+exp(-y))
        return 0.5 * (jnp.tanh(0.5 * y) + 1.0)
    if act == "selu":
        neg = _SELU_ALPHA * (jnp.exp(jnp.minimum(y, 0.0)) - 1.0)
        return _SELU_SCALE * jnp.where(y > 0, y, neg)
    raise ValueError(act)


def _round_up(x, m):
    return ((x + m - 1) // m) * m


def _choose_rows(m, cap=_TM_CAP):
    """Return (padded_rows, row_tile) with row_tile dividing padded_rows.

    For all shapes in this network M is already a multiple of 16, so no
    padding / slicing copies are emitted around the pallas_call."""
    mp = _round_up(m, 16)
    if mp <= cap:
        return mp, mp
    for tm in range(cap, 15, -16):
        if mp % tm == 0:
            return mp, tm
    return _round_up(mp, cap), cap


def _mm_kernel(a_ref, w_ref, b_ref, o_ref, *, act):
    y = jnp.dot(a_ref[...], w_ref[...], preferred_element_type=jnp.float32)
    o_ref[...] = _apply_act(y + b_ref[...], act)


def _mm_prologue_kernel(a_ref, s_ref, t_ref, w_ref, b_ref, o_ref, *, act):
    # fused eval-BatchNorm + ReLU prologue (per im2col column), then MXU matmul
    a = a_ref[...].astype(jnp.float32) * s_ref[...] + t_ref[...]
    a = jnp.maximum(a, 0.0).astype(jnp.bfloat16)
    y = jnp.dot(a, w_ref[...], preferred_element_type=jnp.float32)
    o_ref[...] = _apply_act(y + b_ref[...], act)


def _matmul(a, w, b, pre_scale=None, pre_shift=None, *, act="none"):
    """act([relu(a*s+t)] @ w + b) with bf16 MXU operands, f32 accumulation."""
    m, k = a.shape
    n = w.shape[1]
    mp, tm = _choose_rows(m)
    a = a.astype(jnp.bfloat16)
    if mp != m:                       # only tiny (batch-size) matmuls hit this
        a = jnp.pad(a, ((0, mp - m), (0, 0)))
    w = w.astype(jnp.bfloat16)
    bvec = jnp.zeros((n,), jnp.float32) if b is None else b
    bvec = bvec.astype(jnp.float32).reshape(1, n)

    flops = 2 * mp * k * n
    trans = mp * n if act in ("selu", "sigmoid") else 0
    bytes_acc = mp * k * 2 + k * n * 2 + mp * n * 4 + 4 * n
    cost = pl.CostEstimate(flops=flops, transcendentals=trans,
                           bytes_accessed=bytes_acc)

    if pre_scale is not None:
        kern = functools.partial(_mm_prologue_kernel, act=act)
        in_specs = [
            pl.BlockSpec((tm, k), lambda i: (i, 0)),
            pl.BlockSpec((1, k), lambda i: (0, 0)),
            pl.BlockSpec((1, k), lambda i: (0, 0)),
            pl.BlockSpec((k, n), lambda i: (0, 0)),
            pl.BlockSpec((1, n), lambda i: (0, 0)),
        ]
        args = (a,
                pre_scale.reshape(1, k).astype(jnp.float32),
                pre_shift.reshape(1, k).astype(jnp.float32),
                w, bvec)
    else:
        kern = functools.partial(_mm_kernel, act=act)
        in_specs = [
            pl.BlockSpec((tm, k), lambda i: (i, 0)),
            pl.BlockSpec((k, n), lambda i: (0, 0)),
            pl.BlockSpec((1, n), lambda i: (0, 0)),
        ]
        args = (a, w, bvec)

    out = pl.pallas_call(
        kern,
        out_shape=jax.ShapeDtypeStruct((mp, n), jnp.float32),
        grid=(mp // tm,),
        in_specs=in_specs,
        out_specs=pl.BlockSpec((tm, n), lambda i: (i, 0)),
        compiler_params=pltpu.CompilerParams(
            dimension_semantics=("parallel",)),
        cost_estimate=cost,
    )(*args)
    return out[:m] if mp != m else out


def _affine_kernel(x_ref, s_ref, t_ref, o_ref, *, act):
    o_ref[...] = _apply_act(x_ref[...] * s_ref[...] + t_ref[...], act)


def _affine(x2d, scale, shift, *, act="none"):
    """Row-parallel act(x*scale + shift); x2d:(M,C), scale/shift:(C,)."""
    m0, c0 = x2d.shape
    x, s, t = x2d, scale, shift
    # lane-pack small channel counts so stores are full 128-lane vectors
    if c0 < 128 and 128 % c0 == 0 and m0 % (128 // c0) == 0:
        rep = 128 // c0
        x = x2d.reshape(m0 // rep, 128)
        s = jnp.tile(scale, rep)
        t = jnp.tile(shift, rep)
    m, c = x.shape
    mp, tm = _choose_rows(m)
    x = x.astype(jnp.float32)
    if mp != m:
        x = jnp.pad(x, ((0, mp - m), (0, 0)))
    out = pl.pallas_call(
        functools.partial(_affine_kernel, act=act),
        out_shape=jax.ShapeDtypeStruct((mp, c), jnp.float32),
        grid=(mp // tm,),
        in_specs=[
            pl.BlockSpec((tm, c), lambda i: (i, 0)),
            pl.BlockSpec((1, c), lambda i: (0, 0)),
            pl.BlockSpec((1, c), lambda i: (0, 0)),
        ],
        out_specs=pl.BlockSpec((tm, c), lambda i: (i, 0)),
        compiler_params=pltpu.CompilerParams(
            dimension_semantics=("parallel",)),
    )(x, s.reshape(1, c).astype(jnp.float32),
      t.reshape(1, c).astype(jnp.float32))
    if mp != m:
        out = out[:m]
    return out.reshape(m0, c0)


# ----------------------------------------------------------------------------
# NHWC conv / linear / BN wrappers built on the Pallas kernels
# ----------------------------------------------------------------------------

def _bn_scale_shift(p):
    scale = p["gamma"] / jnp.sqrt(p["var"] + _BN_EPS)
    shift = p["beta"] - p["mean"] * scale
    return scale, shift


def _w_to_mat(w):
    """Torch conv weight (Cout,Cin,kh,kw) -> matmul weight (kh*kw*Cin, Cout)."""
    cout, cin, kh, kw = w.shape
    return jnp.transpose(w, (2, 3, 1, 0)).reshape(kh * kw * cin, cout)


def _im2col_nhwc(x, kh, kw, stride, padding, dilation, pad_value=None):
    b, h, w, c = x.shape
    sh, sw = stride
    ph, pw = padding
    dh, dw = dilation
    ho = (h + 2 * ph - dh * (kh - 1) - 1) // sh + 1
    wo = (w + 2 * pw - dw * (kw - 1) - 1) // sw + 1
    if ph or pw:
        if pad_value is None:
            xp = jnp.pad(x, ((0, 0), (ph, ph), (pw, pw), (0, 0)))
        else:
            pv = pad_value.reshape(1, 1, 1, c)
            xp = jnp.pad(x - pv, ((0, 0), (ph, ph), (pw, pw), (0, 0))) + pv
    else:
        xp = x
    if kh == 1 and kw == 1 and sh == 1 and sw == 1:
        return xp.reshape(b * ho * wo, c), ho, wo
    taps = []
    for i in range(kh):
        for j in range(kw):
            taps.append(xp[:, i * dh: i * dh + (ho - 1) * sh + 1: sh,
                           j * dw: j * dw + (wo - 1) * sw + 1: sw, :])
    col = jnp.stack(taps, axis=3)                 # (b, ho, wo, ntaps, c)
    return col.reshape(b * ho * wo, kh * kw * c), ho, wo


@functools.partial(jax.jit,
                   static_argnames=("stride", "padding", "dilation", "act"))
def conv2d(x, p, bn_pre=None, bn_post=None, *, stride=(1, 1), padding=(0, 0),
           dilation=(1, 1), act="none"):
    """NHWC Conv2d via im2col + Pallas matmul.

    bn_pre : eval-BN applied as BN->ReLU prologue on the input (fused in-kernel)
    bn_post: eval-BN folded into the conv weights / bias (conv -> BN pattern)
    """
    w, bias = p["w"], p["b"]
    cout, cin, kh, kw = w.shape
    b_ = x.shape[0]

    pre_scale = pre_shift = pad_value = None
    if bn_pre is not None:
        s, t = _bn_scale_shift(bn_pre)
        pre_scale = jnp.tile(s, kh * kw)
        pre_shift = jnp.tile(t, kh * kw)
        # pad with the value that the BN->ReLU prologue maps exactly to zero,
        # preserving the zero-padding semantics of BN->ReLU->Conv
        pad_value = -t / s

    wmat = _w_to_mat(w)
    bvec = bias if bias is not None else jnp.zeros((cout,), jnp.float32)
    if bn_post is not None:
        s, t = _bn_scale_shift(bn_post)
        wmat = wmat * s[None, :]
        bvec = bvec * s + t

    a, ho, wo = _im2col_nhwc(x, kh, kw, stride, padding, dilation,
                             pad_value=pad_value)
    y = _matmul(a, wmat, bvec, pre_scale, pre_shift, act=act)
    return y.reshape(b_, ho, wo, cout)


@functools.partial(jax.jit, static_argnames=("d",))
def acblock(x, p, *, d):
    """Fused ACBlock: both BN->ReLU->conv branches in a single Pallas matmul."""
    b_ = x.shape[0]
    cout = p["conv2"]["w"].shape[0]

    s2, t2 = _bn_scale_shift(p["bn2"])
    s3, t3 = _bn_scale_shift(p["bn3"])

    a2, ho, wo = _im2col_nhwc(x, 5, 1, (1, 1), (2 ** (d + 1), 0), (2 ** d, 1),
                              pad_value=-t2 / s2)
    a3, _, _ = _im2col_nhwc(x, 1, 3, (1, 1), (0, 2 ** d), (1, 2 ** d),
                            pad_value=-t3 / s3)
    a = jnp.concatenate([a2, a3], axis=1)

    wmat = jnp.concatenate([_w_to_mat(p["conv2"]["w"]),
                            _w_to_mat(p["conv3"]["w"])], axis=0)
    bias = p["conv2"]["b"] + p["conv3"]["b"]
    pre_scale = jnp.concatenate([jnp.tile(s2, 5), jnp.tile(s3, 3)])
    pre_shift = jnp.concatenate([jnp.tile(t2, 5), jnp.tile(t3, 3)])
    y = _matmul(a, wmat, bias, pre_scale, pre_shift, act="none")
    return y.reshape(b_, ho, wo, cout)


@jax.jit
def conv_transpose_ks(x, p):
    """ConvTranspose2d with kernel_size == stride (the only kind DAnet uses)."""
    w, bias = p["w"], p["b"]
    cin, cout, kh, kw = w.shape
    b_, h, wdt, _ = x.shape
    a = x.reshape(b_ * h * wdt, cin)
    wmat = jnp.transpose(w, (0, 2, 3, 1)).reshape(cin, kh * kw * cout)
    bvec = jnp.tile(bias, kh * kw)
    y = _matmul(a, wmat, bvec, act="none")
    y = y.reshape(b_, h, wdt, kh, kw, cout).transpose(0, 1, 3, 2, 4, 5)
    return y.reshape(b_, h * kh, wdt * kw, cout)


@functools.partial(jax.jit, static_argnames=("act",))
def conv1x1_pair(x, p1, p2, *, act="none"):
    """Two 1x1 convs sharing one input fused into a lane-wider matmul."""
    b_, h, w, c = x.shape
    n1 = p1["w"].shape[0]
    wmat = jnp.concatenate([_w_to_mat(p1["w"]), _w_to_mat(p2["w"])], axis=1)
    bias = jnp.concatenate([p1["b"], p2["b"]])
    y = _matmul(x.reshape(b_ * h * w, c), wmat, bias, act=act)
    y = y.reshape(b_, h, w, -1)
    return y[..., :n1], y[..., n1:]


@functools.partial(jax.jit, static_argnames=("act",))
def linear(x, p, *, act="none"):
    return _matmul(x, p["w"].T, p["b"], act=act)


@functools.partial(jax.jit, static_argnames=("act",))
def affine_nhwc(x, scale, shift, *, act="none"):
    b, h, w, c = x.shape
    y = _affine(x.reshape(b * h * w, c), scale, shift, act=act)
    return y.reshape(b, h, w, c)


def batchnorm(x, p, *, act="none"):
    """Eval-mode BatchNorm2d (running stats) on NHWC input."""
    scale, shift = _bn_scale_shift(p)
    return affine_nhwc(x, scale, shift, act=act)


def conv1d(x, p, pad, act):
    # x: (B, L, C); torch Conv1d weights stored as (Cout, Cin, 1, k)
    y = conv2d(x[:, None, :, :], p, padding=(0, pad), act=act)
    return y[:, 0, :, :]


# ----------------------------------------------------------------------------
# Deterministic parameter initialization (PyTorch weight layouts)
# ----------------------------------------------------------------------------

def conv_p(rs, cin, cout, kh, kw, bias=True):
    fan = cin * kh * kw
    w = jnp.asarray(rs.standard_normal((cout, cin, kh, kw)) / math.sqrt(fan),
                    jnp.float32)
    b = (jnp.asarray(rs.standard_normal((cout,)) * 0.01, jnp.float32)
         if bias else None)
    return {"w": w, "b": b}


def convT_p(rs, cin, cout, kh, kw):
    w = jnp.asarray(rs.standard_normal((cin, cout, kh, kw)) / math.sqrt(cin),
                    jnp.float32)
    b = jnp.asarray(rs.standard_normal((cout,)) * 0.01, jnp.float32)
    return {"w": w, "b": b}


def linear_p(rs, din, dout):
    w = jnp.asarray(rs.standard_normal((dout, din)) / math.sqrt(din),
                    jnp.float32)
    b = jnp.asarray(rs.standard_normal((dout,)) * 0.01, jnp.float32)
    return {"w": w, "b": b}


def bn_p(rs, c):
    return {"gamma": jnp.asarray(1.0 + 0.05 * rs.standard_normal((c,)),
                                 jnp.float32),
            "beta": jnp.asarray(0.05 * rs.standard_normal((c,)), jnp.float32),
            "mean": jnp.zeros((c,), jnp.float32),
            "var": jnp.ones((c,), jnp.float32)}


# ----------------------------------------------------------------------------
# Modules (init + forward), NHWC layout
# ----------------------------------------------------------------------------

def acblock_init(rs, cin, cout):
    return {"bn2": bn_p(rs, cin), "conv2": conv_p(rs, cin, cout, 5, 1),
            "bn3": bn_p(rs, cin), "conv3": conv_p(rs, cin, cout, 1, 3)}


def denselayer_init(rs, nif, growth):
    return {"ac1": acblock_init(rs, nif, growth),
            "ac2": acblock_init(rs, growth, growth),
            "bn3": bn_p(rs, growth),
            "conv3": conv_p(rs, growth, growth, 3, 3, bias=False),
            "skip_conv": conv_p(rs, nif, growth, 1, 1),
            "skip_bn": bn_p(rs, growth)}


def denselayer_fwd(p, x, d):
    residual = conv2d(x, p["skip_conv"], bn_post=p["skip_bn"])   # conv+BN folded
    h = acblock(x, p["ac1"], d=d)
    h = acblock(h, p["ac2"], d=d + 1)
    h = conv2d(h, p["conv3"], bn_pre=p["bn3"],
               padding=(2 ** (d + 1), 2 ** (d + 1)),
               dilation=(2 ** (d + 1), 2 ** (d + 1)))
    # conv_block is shape preserving -> _pad is a no-op; dropout identity (eval)
    return h + residual


def denseblock_init(rs, num_layers, nif, growth):
    layers, cin = [], nif
    for _ in range(num_layers):
        layers.append(denselayer_init(rs, cin, growth))
        cin = growth
    out_ch = nif + num_layers * growth
    return {"layers": layers,
            "bn1x1": bn_p(rs, out_ch),
            "conv1x1": conv_p(rs, out_ch, growth, 1, 1),
            "skip_conv": conv_p(rs, nif, growth, 1, 1),
            "skip_bn": bn_p(rs, growth)}


def denseblock_fwd(p, x):
    residual = conv2d(x, p["skip_conv"], bn_post=p["skip_bn"])
    feats, h = [x], x
    for d, lp in enumerate(p["layers"]):
        h = denselayer_fwd(lp, h, d)
        feats.append(h)
    cat = jnp.concatenate(feats, axis=-1)
    out = conv2d(cat, p["conv1x1"], bn_pre=p["bn1x1"])
    return out + residual


def hglayer_init(rs, cin, cout, rate, axis):
    kh, kw = (rate, 1) if axis == "F" else (1, rate)
    return {"cd1": conv_p(rs, cin, cout, 1, 1),
            "up": convT_p(rs, 16, 16, kh, kw),
            "cd": conv_p(rs, cout * 2, cout, 1, 1)}


def hglayer_fwd(p, x, x_sup):
    xs = conv2d(x_sup, p["cd1"], act="selu")
    xs = conv_transpose_ks(xs, p["up"])
    wgt = jax.nn.sigmoid(xs)
    xcat = jnp.concatenate([x * wgt, xs], axis=-1)
    return conv2d(xcat, p["cd"], act="selu")


def msmodule_init(rs, axis):
    kh, kw = (2, 1) if axis == "F" else (1, 2)
    return {"axis": axis,
            "En1": denseblock_init(rs, 4, 32, 16),
            "pool1": conv_p(rs, 16, 16, 1, 1),
            "En2": denseblock_init(rs, 4, 16, 16),
            "pool2": conv_p(rs, 16, 16, 1, 1),
            "En3": denseblock_init(rs, 4, 16, 16),
            "pool3": conv_p(rs, 16, 16, 1, 1),
            "Enter": denseblock_init(rs, 4, 16, 16),
            "up3": convT_p(rs, 16, 16, kh, kw),
            "De3": denseblock_init(rs, 4, 16, 16),
            "up2": convT_p(rs, 16, 16, kh, kw),
            "De2": denseblock_init(rs, 4, 16, 16),
            "up1": convT_p(rs, 16, 16, kh, kw),
            "De1": denseblock_init(rs, 4, 16, 16),
            "hg1": hglayer_init(rs, 16, 16, 2, axis),
            "hg2": hglayer_init(rs, 16, 16, 2, axis)}


def _maxpool(x, axis):
    b, h, w, c = x.shape
    if axis == "F":
        return x.reshape(b, h // 2, 2, w, c).max(axis=2)
    return x.reshape(b, h, w // 2, 2, c).max(axis=3)


def msmodule_fwd(p, x):
    axis = p["axis"]
    x1 = denseblock_fwd(p["En1"], x)
    x_1 = _maxpool(conv2d(x1, p["pool1"]), axis)
    x2 = denseblock_fwd(p["En2"], x_1)
    x_2 = _maxpool(conv2d(x2, p["pool2"]), axis)
    x3 = denseblock_fwd(p["En3"], x_2)
    x_3 = _maxpool(conv2d(x3, p["pool3"]), axis)
    xy = denseblock_fwd(p["Enter"], x_3)
    hg1 = hglayer_fwd(p["hg1"], x_2, xy)
    hg2 = hglayer_fwd(p["hg2"], x_1, hg1)
    y3 = conv_transpose_ks(xy, p["up3"])
    y_3 = denseblock_fwd(p["De3"], y3) + hg1
    y2 = conv_transpose_ks(y_3, p["up2"])
    y_2 = denseblock_fwd(p["De2"], y2) + hg2
    y1 = conv_transpose_ks(y_2, p["up1"])
    return denseblock_fwd(p["De1"], y1)


def tfa_init(rs):
    return {"bn": bn_p(rs, 16),
            "t1": conv_p(rs, 16, 16, 1, 3), "t2": conv_p(rs, 16, 16, 1, 3),
            "f1": conv_p(rs, 16, 16, 1, 5), "f2": conv_p(rs, 16, 16, 1, 5)}


def tfa_fwd(p, x):
    x = batchnorm(x, p["bn"])
    a_t = jnp.mean(x, axis=1)                       # (B, T, C)
    a_f = jnp.mean(x, axis=2)                       # (B, F, C)
    a_t = conv1d(a_t, p["t1"], 1, "relu")
    a_t = conv1d(a_t, p["t2"], 1, "sigmoid")
    a_f = conv1d(a_f, p["f1"], 2, "relu")
    a_f = conv1d(a_f, p["f2"], 2, "sigmoid")
    a_t = a_t[:, None, :, :]                        # (B, 1, T, C)
    a_f = a_f[:, :, None, :]                        # (B, F, 1, C)
    a_ft = a_t * a_f
    f_ft = x * a_ft
    f_f = x * a_f
    f_t = x * a_t
    return f_ft, f_f, f_t


def cattn_init(rs, input_num=3, in_channel=16, reduction=16):
    d = 21 * in_channel
    return {"bn": bn_p(rs, 16),
            "fc1": [linear_p(rs, d, d // reduction) for _ in range(input_num)],
            "fc2": [linear_p(rs, d // reduction, d) for _ in range(input_num)],
            "cr": [[linear_p(rs, d, in_channel),
                    linear_p(rs, in_channel, in_channel)] for _ in range(3)]}


def _adaptive_avgpool(x, n):
    b, h, w, c = x.shape
    pooled = x.reshape(b, n, h // n, n, w // n, c).mean(axis=(2, 4))  # (b,n,n,c)
    return pooled.transpose(0, 3, 1, 2)                               # (b,c,n,n)


def cattn_fwd(p, xs):
    # eval-mode BN is affine => sum_i BN(x_i) == scale * sum_i x_i + len(xs)*shift
    scale, shift = _bn_scale_shift(p["bn"])
    xsum = xs[0]
    for x_s in xs[1:]:
        xsum = xsum + x_s
    fused = affine_nhwc(xsum, scale, shift * float(len(xs)))
    b, c = fused.shape[0], fused.shape[-1]
    y1 = _adaptive_avgpool(fused, 4).reshape(b, 16 * c)
    y2 = _adaptive_avgpool(fused, 2).reshape(b, 4 * c)
    y3 = _adaptive_avgpool(fused, 1).reshape(b, c)
    y = jnp.concatenate([y1, y2, y3], axis=1)
    masks = []
    for i in range(len(xs)):
        yq = linear(y, p["fc1"][i], act="relu6")
        ye = linear(yq, p["fc2"][i])
        ye = linear(ye, p["cr"][i][0], act="relu6")
        ye = linear(ye, p["cr"][i][1])
        masks.append(ye)                                   # (b, 16)
    mask_stack = jax.nn.softmax(jnp.stack(masks, axis=-1), axis=-2)
    selected = None
    for i, x_s in enumerate(xs):
        v = x_s * mask_stack[:, :, i][:, None, None, :]
        selected = v if selected is None else selected + v
    return selected


def danet_init(rs):
    return {"bn": bn_p(rs, 3),
            "bm": [conv_p(rs, 3, 16, 4, 1), conv_p(rs, 16, 16, 3, 1),
                   conv_p(rs, 16, 16, 6, 1), conv_p(rs, 16, 1, 5, 1)],
            "hugF": msmodule_init(rs, "F"),
            "hugT": msmodule_init(rs, "T"),
            "cfp1": conv_p(rs, 16, 16, 1, 1), "cfp2": conv_p(rs, 16, 16, 1, 1),
            "cfp3": conv_p(rs, 16, 16, 3, 3),
            "tcfp1": conv_p(rs, 16, 16, 1, 1), "tcfp2": conv_p(rs, 16, 16, 1, 1),
            "tcfp3": conv_p(rs, 16, 16, 3, 3),
            "tfa": tfa_init(rs),
            "cattn": cattn_init(rs),
            "chup1": conv_p(rs, 3, 16, 5, 5), "chup2": conv_p(rs, 16, 32, 5, 5),
            "chdn1": conv_p(rs, 32, 16, 5, 5), "chdn2": conv_p(rs, 16, 1, 5, 5)}


def danet_fwd(p, x_nchw):
    x = jnp.transpose(x_nchw, (0, 2, 3, 1))          # NCHW -> NHWC once
    x = batchnorm(x, p["bn"])
    bm = conv2d(x, p["bm"][0], stride=(4, 1), act="selu")
    bm = conv2d(bm, p["bm"][1], stride=(3, 1), act="selu")
    bm = conv2d(bm, p["bm"][2], stride=(6, 1), act="selu")
    bm = conv2d(bm, p["bm"][3], stride=(5, 1), act="selu")
    x_pre = conv2d(x, p["chup1"], padding=(2, 2), act="selu")
    x_pre = conv2d(x_pre, p["chup2"], padding=(2, 2), act="selu")
    f_hug = msmodule_fwd(p["hugF"], x_pre)
    t_hug = msmodule_fwd(p["hugT"], x_pre)
    x_cfp1, x_cfp2 = conv1x1_pair(f_hug, p["cfp1"], p["cfp2"], act="selu")
    x_cfp3 = conv2d(f_hug, p["cfp3"], padding=(1, 1), act="selu")
    x_tcfp1, x_tcfp2 = conv1x1_pair(t_hug, p["tcfp1"], p["tcfp2"], act="selu")
    x_tcfp3 = conv2d(t_hug, p["tcfp3"], padding=(1, 1), act="selu")
    x_diff = (x_cfp2 - x_cfp3) + (x_tcfp2 - x_tcfp3)
    attn, a_ft, a_tf = tfa_fwd(p["tfa"], x_diff)
    x_cattn = cattn_fwd(p["cattn"], [attn, a_ft, a_tf])
    x_preout = x_cattn + x_cfp1
    x_out = jnp.concatenate([x_preout, x_tcfp1], axis=-1)
    x_out = conv2d(x_out, p["chdn1"], padding=(2, 2), act="selu")
    x_out = conv2d(x_out, p["chdn2"], padding=(2, 2), act="selu")
    x_out = jnp.concatenate([bm, x_out], axis=1)      # concat along H (freq)
    output = jax.nn.softmax(x_out, axis=1)            # softmax over H
    # return PyTorch NCHW layout
    return (jnp.transpose(output, (0, 3, 1, 2)),
            jnp.transpose(x_out, (0, 3, 1, 2)))


# ----------------------------------------------------------------------------
# main
# ----------------------------------------------------------------------------

if __name__ == "__main__":
    # H must be >= 360 for bm_layer (strides 4*3*6*5) and divisible by 8 for
    # the F-axis pooling path; W must be divisible by 8 for the T-axis path.
    B, C, H, W = 2, 3, 360, 8
    params = danet_init(np.random.RandomState(42))
    x = jax.random.normal(jax.random.PRNGKey(0), (B, C, H, W), jnp.float32)

    output, output_pre = danet_fwd(params, x)
    jax.block_until_ready((output, output_pre))

    assert output.shape == (B, 1, 361, W), output.shape
    assert output_pre.shape == (B, 1, 361, W), output_pre.shape
    assert bool(jnp.isfinite(output).all())
    assert bool(jnp.isfinite(output_pre).all())
    print("KERNEL_OK")
</pallas_src>

<mosaic_0001>
module attributes {stable_mosaic.version = 11 : i64} {
  func.func @_affine_kernel(%arg0: i32, %arg1: memref<960x3xf32, #tpu.memory_space<vmem>>, %arg2: memref<1x3xf32, #tpu.memory_space<vmem>>, %arg3: memref<1x3xf32, #tpu.memory_space<vmem>>, %arg4: memref<960x3xf32, #tpu.memory_space<vmem>>) attributes {dimension_semantics = [#tpu.dimension_semantics<parallel>], iteration_bounds = array<i64: 6>, scalar_prefetch = 0 : i64, scratch_operands = 0 : i64, tpu.core_type = #tpu.core_type<tc>, window_params = [{transform_indices = @transform_0, window_bounds = array<i64: 960, 3>}, {pipeline_mode = #tpu.pipeline_mode<synchronous>, transform_indices = @transform_1, window_bounds = array<i64: 1, 3>}, {pipeline_mode = #tpu.pipeline_mode<synchronous>, transform_indices = @transform_2, window_bounds = array<i64: 1, 3>}, {transform_indices = @transform_3, window_bounds = array<i64: 960, 3>}]} {
    %c0 = arith.constant 0 : index
    %c0_0 = arith.constant 0 : index
    %0 = vector.load %arg1[%c0, %c0_0] : memref<960x3xf32, #tpu.memory_space<vmem>>, vector<960x3xf32>
    %c0_1 = arith.constant 0 : index
    %c0_2 = arith.constant 0 : index
    %1 = vector.load %arg2[%c0_1, %c0_2] : memref<1x3xf32, #tpu.memory_space<vmem>>, vector<1x3xf32>
    %2 = vector.broadcast %1 : vector<1x3xf32> to vector<960x3xf32>
    %3 = arith.mulf %0, %2 : vector<960x3xf32>
    %c0_3 = arith.constant 0 : index
    %c0_4 = arith.constant 0 : index
    %4 = vector.load %arg3[%c0_3, %c0_4] : memref<1x3xf32, #tpu.memory_space<vmem>>, vector<1x3xf32>
    %5 = vector.broadcast %4 : vector<1x3xf32> to vector<960x3xf32>
    %6 = arith.addf %3, %5 : vector<960x3xf32>
    %c0_5 = arith.constant 0 : index
    %c0_6 = arith.constant 0 : index
    %7 = vector.load %arg4[%c0_5, %c0_6] : memref<960x3xf32, #tpu.memory_space<vmem>>, vector<960x3xf32>
    tpu.vector_store %arg4[%c0_5, %c0_6], %6 {strides = array<i32>} : memref<960x3xf32, #tpu.memory_space<vmem>>, vector<960x3xf32>,
    return
  }
  func.func @transform_0(%arg0: i32) -> (i32, i32) {
    %c0_i32 = arith.constant 0 : i32
    %c0_i32_0 = arith.constant 0 : i32
    return %arg0, %c0_i32 : i32, i32
  }
  func.func @transform_1(%arg0: i32) -> (i32, i32) {
    %c0_i32 = arith.constant 0 : i32
    %c0_i32_0 = arith.constant 0 : i32
    %c0_i32_1 = arith.constant 0 : i32
    return %c0_i32, %c0_i32_0 : i32, i32
  }
  func.func @transform_2(%arg0: i32) -> (i32, i32) {
    %c0_i32 = arith.constant 0 : i32
    %c0_i32_0 = arith.constant 0 : i32
    %c0_i32_1 = arith.constant 0 : i32
    return %c0_i32, %c0_i32_0 : i32, i32
  }
  func.func @transform_3(%arg0: i32) -> (i32, i32) {
    %c0_i32 = arith.constant 0 : i32
    %c0_i32_0 = arith.constant 0 : i32
    return %arg0, %c0_i32 : i32, i32
  }
}

</mosaic_0001>

<bundles_post_ra>
// kernel: affine_nhwc.1
= control target key start
LH: loop header
LB: loop body
LE: loop exit
PB: predicated region body
PF: predicated region fallthrough
CT: control target
= control target key end

     0   :  { %s766_s12 = smov 0   ;;  %s1397_s0 = inlined_call_operand.vmem [shape: f32[5760,3], index: 0, kind: input, shape index: {}]   ;;  %s1398_s1 = inlined_call_operand.vmem [shape: f32[1,3], index: 1, kind: input, shape index: {}]   ;;  %s1399_s2 = inlined_call_operand.vmem [shape: f32[1,3], index: 2, kind: input, shape index: {}]   ;;  %s1400_s3 = inlined_call_operand.vmem [shape: f32[5760,3], index: 3, kind: output, shape index: {}]  }
   0x1 LB: > { %s719_s13 = sadd.s32 4294967295, %s744_s12   ;;  %p723_p0 = scmp.ge.s32.totalorder %s744_s12, 1  ;;  %s744_s12 = sphi %s766_s12, %s13_s12  }
   0x2   : > { %p138_p1 = scmp.lt.s32.totalorder %s744_s12, 7 }
   0x4   : > { %p139_p2 = pnand %p723_p0, %p138_p1 }
   0x5   : > { %s162_s14 = smul.u32 (!%p139_p2), 120, %s719_s13 }
   0x6   : > { %142 = sbr.rel (%p139_p2) target bundleno = 139 (0x8b), region = 32 }
   0x7   : > { %p163_p3 = scmp.lt.s32.totalorder (!%p139_p2), %s162_s14, 719 }
   0xb   : > { %s1402_s14 = smov (!%p163_p3, %s162_s14), 719  ;;  %v777_v0 = vld [vmem:[%s1398_s1] ss:$0 sm:$0xff]  ;;  %vm542_vm0 = vcmask 23552  }
   0xc   : > { %s724_s17 = sshll.u32 %s1402_s14, 3  ;;  %v787_v1 = vld [vmem:[%s1399_s2] ss:$0 sm:$0xff] }
   0xd   : > { %s782_s20 = scalar_lea.vmem %s1397_s0, %s724_s17  ;;  %s801_s25 = scalar_lea.vmem %s1400_s3, %s724_s17 }
   0xe   : > { %v174_v2 = vld [vmem:[%s782_s20] sm:$0xff]  ;;  %v175_v3 = vld [vmem:[%s782_s20 + $0x8] sm:$0xff]  ;;  %v176_v4 = vld [vmem:[%s782_s20 + $0x10] sm:$0xff] }
   0xf   : > { %v298_v5 = vmul.f32 %v777_v0, %v174_v2  ;;  %v299_v6 = vmul.f32 %v777_v0, %v175_v3  ;;  %v300_v7 = vmul.f32 %v777_v0, %v176_v4  ;;  %v177_v8 = vld [vmem:[%s782_s20 + $0x18] sm:$0xff]  ;;  %v178_v9 = vld [vmem:[%s782_s20 + $0x20] sm:$0xff]  ;;  %v179_v10 = vld [vmem:[%s782_s20 + $0x28] sm:$0xff] }
  0x10   : > { %v301_v11 = vmul.f32 %v777_v0, %v177_v8  ;;  %v302_v12 = vmul.f32 %v777_v0, %v178_v9  ;;  %v303_v13 = vmul.f32 %v777_v0, %v179_v10  ;;  %v180_v14 = vld [vmem:[%s782_s20 + $0x30] sm:$0xff]  ;;  %v181_v15 = vld [vmem:[%s782_s20 + $0x38] sm:$0xff]  ;;  %v182_v16 = vld [vmem:[%s782_s20 + $0x40] sm:$0xff] }
  0x11   : > { %v422_v17 = vadd.f32 %v787_v1, %v298_v5  ;;  %v423_v18 = vadd.f32 %v787_v1, %v299_v6  ;;  %v424_v19 = vadd.f32 %v787_v1, %v300_v7  ;;  %v304_v20 = vmul.f32 %v777_v0, %v180_v14  ;;  %v183_v21 = vld [vmem:[%s782_s20 + $0x48] sm:$0xff]  ;;  %v184_v24 = vld [vmem:[%s782_s20 + $0x50] sm:$0xff]  ;;  %v185_v27 = vld [vmem:[%s782_s20 + $0x58] sm:$0xff] }
  0x12   : > { %v425_v22 = vadd.f32 %v787_v1, %v301_v11  ;;  %v305_v23 = vmul.f32 %v777_v0, %v181_v15  ;;  %v426_v25 = vadd.f32 %v787_v1, %v302_v12  ;;  %v306_v26 = vmul.f32 %v777_v0, %v182_v16  ;;  %v186_v30 = vld [vmem:[%s782_s20 + $0x60] sm:$0xff]  ;;  %v187_v33 = vld [vmem:[%s782_s20 + $0x68] sm:$0xff]  ;;  %v188_v36 = vld [vmem:[%s782_s20 + $0x70] sm:$0xff] }
  0x13   : > { %543 = vst.msk [vmem:[%s801_s25] sm:$0xff] %vm542_vm0, %v422_v17  ;;  %v427_v28 = vadd.f32 %v787_v1, %v303_v13  ;;  %v307_v29 = vmul.f32 %v777_v0, %v183_v21  ;;  %v428_v31 = vadd.f32 %v787_v1, %v304_v20  ;;  %v308_v32 = vmul.f32 %v777_v0, %v184_v24  ;;  %v189_v39 = vld [vmem:[%s782_s20 + $0x78] sm:$0xff]  ;;  %v190_v42 = vld [vmem:[%s782_s20 + $0x80] sm:$0xff]  ;;  %v191_v45 = vld [vmem:[%s782_s20 + $0x88] sm:$0xff] }
  0x14   : > { %544 = vst.msk [vmem:[%s801_s25 + $0x8] sm:$0xff] %vm542_vm0, %v423_v18  ;;  %v429_v34 = vadd.f32 %v787_v1, %v305_v23  ;;  %v309_v35 = vmul.f32 %v777_v0, %v185_v27  ;;  %v430_v37 = vadd.f32 %v787_v1, %v306_v26  ;;  %v310_v38 = vmul.f32 %v777_v0, %v186_v30  ;;  %v192_v48 = vld [vmem:[%s782_s20 + $0x90] sm:$0xff]  ;;  %v193_v51 = vld [vmem:[%s782_s20 + $0x98] sm:$0xff]  ;;  %v194_v54 = vld [vmem:[%s782_s20 + $0xa0] sm:$0xff] }
  0x15   : > { %545 = vst.msk [vmem:[%s801_s25 + $0x10] sm:$0xff] %vm542_vm0, %v424_v19  ;;  %v431_v40 = vadd.f32 %v787_v1, %v307_v29  ;;  %v311_v41 = vmul.f32 %v777_v0, %v187_v33  ;;  %v432_v43 = vadd.f32 %v787_v1, %v308_v32  ;;  %v312_v44 = vmul.f32 %v777_v0, %v188_v36  ;;  %v195_v57 = vld [vmem:[%s782_s20 + $0xa8] sm:$0xff]  ;;  %v196_v60 = vld [vmem:[%s782_s20 + $0xb0] sm:$0xff]  ;;  %v197_v63 = vld [vmem:[%s782_s20 + $0xb8] sm:$0xff] }
  0x16   : > { %546 = vst.msk [vmem:[%s801_s25 + $0x18] sm:$0xff] %vm542_vm0, %v425_v22  ;;  %v433_v46 = vadd.f32 %v787_v1, %v309_v35  ;;  %v313_v47 = vmul.f32 %v777_v0, %v189_v39  ;;  %v434_v49 = vadd.f32 %v787_v1, %v310_v38  ;;  %v314_v50 = vmul.f32 %v777_v0, %v190_v42  ;;  %v198_v4 = vld [vmem:[%s782_s20 + $0xc0] sm:$0xff]  ;;  %v199_v7 = vld [vmem:[%s782_s20 + $0xc8] sm:$0xff]  ;;  %v200_v10 = vld [vmem:[%s782_s20 + $0xd0] sm:$0xff] }
  0x17   : > { %547 = vst.msk [vmem:[%s801_s25 + $0x20] sm:$0xff] %vm542_vm0, %v426_v25  ;;  %v435_v52 = vadd.f32 %v787_v1, %v311_v41  ;;  %v315_v53 = vmul.f32 %v777_v0, %v191_v45  ;;  %v436_v55 = vadd.f32 %v787_v1, %v312_v44  ;;  %v316_v56 = vmul.f32 %v777_v0, %v192_v48  ;;  %v201_v13 = vld [vmem:[%s782_s20 + $0xd8] sm:$0xff]  ;;  %v202_v16 = vld [vmem:[%s782_s20 + $0xe0] sm:$0xff]  ;;  %v203_v19 = vld [vmem:[%s782_s20 + $0xe8] sm:$0xff] }
  0x18   : > { %548 = vst.msk [vmem:[%s801_s25 + $0x28] sm:$0xff] %vm542_vm0, %v427_v28  ;;  %v437_v58 = vadd.f32 %v787_v1, %v313_v47  ;;  %v317_v59 = vmul.f32 %v777_v0, %v193_v51  ;;  %v438_v61 = vadd.f32 %v787_v1, %v314_v50  ;;  %v318_v62 = vmul.f32 %v777_v0, %v194_v54  ;;  %v204_v22 = vld [vmem:[%s782_s20 + $0xf0] sm:$0xff]  ;;  %v205_v25 = vld [vmem:[%s782_s20 + $0xf8] sm:$0xff]  ;;  %v206_v28 = vld [vmem:[%s782_s20 + $0x100] sm:$0xff] }
  0x19   : > { %549 = vst.msk [vmem:[%s801_s25 + $0x30] sm:$0xff] %vm542_vm0, %v428_v31  ;;  %v439_v2 = vadd.f32 %v787_v1, %v315_v53  ;;  %v319_v3 = vmul.f32 %v777_v0, %v195_v57  ;;  %v440_v5 = vadd.f32 %v787_v1, %v316_v56  ;;  %v320_v6 = vmul.f32 %v777_v0, %v196_v60  ;;  %v207_v31 = vld [vmem:[%s782_s20 + $0x108] sm:$0xff] }
  0x1a   : > { %550 = vst.msk [vmem:[%s801_s25 + $0x38] sm:$0xff] %vm542_vm0, %v429_v34  ;;  %v441_v8 = vadd.f32 %v787_v1, %v317_v59  ;;  %v321_v9 = vmul.f32 %v777_v0, %v197_v63  ;;  %v442_v11 = vadd.f32 %v787_v1, %v318_v62  ;;  %v322_v12 = vmul.f32 %v777_v0, %v198_v4  ;;  %v208_v34 = vld [vmem:[%s782_s20 + $0x110] sm:$0xff] }
  0x1b   : > { %551 = vst.msk [vmem:[%s801_s25 + $0x40] sm:$0xff] %vm542_vm0, %v430_v37  ;;  %v443_v14 = vadd.f32 %v787_v1, %v319_v3  ;;  %v323_v15 = vmul.f32 %v777_v0, %v199_v7  ;;  %v444_v17 = vadd.f32 %v787_v1, %v320_v6  ;;  %v324_v18 = vmul.f32 %v777_v0, %v200_v10  ;;  %v209_v37 = vld [vmem:[%s782_s20 + $0x118] sm:$0xff] }
  0x1c   : > { %552 = vst.msk [vmem:[%s801_s25 + $0x48] sm:$0xff] %vm542_vm0, %v431_v40  ;;  %v445_v20 = vadd.f32 %v787_v1, %v321_v9  ;;  %v325_v21 = vmul.f32 %v777_v0, %v201_v13  ;;  %v446_v23 = vadd.f32 %v787_v1, %v322_v12  ;;  %v326_v24 = vmul.f32 %v777_v0, %v202_v16  ;;  %v210_v40 = vld [vmem:[%s782_s20 + $0x120] sm:$0xff] }
  0x1d   : > { %553 = vst.msk [vmem:[%s801_s25 + $0x50] sm:$0xff] %vm542_vm0, %v432_v43  ;;  %v447_v26 = vadd.f32 %v787_v1, %v323_v15  ;;  %v327_v27 = vmul.f32 %v777_v0, %v203_v19  ;;  %v448_v29 = vadd.f32 %v787_v1, %v324_v18  ;;  %v328_v30 = vmul.f32 %v777_v0, %v204_v22  ;;  %v211_v43 = vld [vmem:[%s782_s20 + $0x128] sm:$0xff] }
  0x1e   : > { %554 = vst.msk [vmem:[%s801_s25 + $0x58] sm:$0xff] %vm542_vm0, %v433_v46  ;;  %v449_v32 = vadd.f32 %v787_v1, %v325_v21  ;;  %v329_v33 = vmul.f32 %v777_v0, %v205_v25  ;;  %v450_v35 = vadd.f32 %v787_v1, %v326_v24  ;;  %v330_v36 = vmul.f32 %v777_v0, %v206_v28  ;;  %v212_v46 = vld [vmem:[%s782_s20 + $0x130] sm:$0xff] }
  0x1f   : > { %555 = vst.msk [vmem:[%s801_s25 + $0x60] sm:$0xff] %vm542_vm0, %v434_v49  ;;  %v451_v38 = vadd.f32 %v787_v1, %v327_v27  ;;  %v331_v39 = vmul.f32 %v777_v0, %v207_v31  ;;  %v452_v41 = vadd.f32 %v787_v1, %v328_v30  ;;  %v332_v42 = vmul.f32 %v777_v0, %v208_v34  ;;  %v213_v49 = vld [vmem:[%s782_s20 + $0x138] sm:$0xff] }
  0x20   : > { %556 = vst.msk [vmem:[%s801_s25 + $0x68] sm:$0xff] %vm542_vm0, %v435_v52  ;;  %v453_v44 = vadd.f32 %v787_v1, %v329_v33  ;;  %v333_v45 = vmul.f32 %v777_v0, %v209_v37  ;;  %v454_v47 = vadd.f32 %v787_v1, %v330_v36  ;;  %v334_v48 = vmul.f32 %v777_v0, %v210_v40  ;;  %v214_v52 = vld [vmem:[%s782_s20 + $0x140] sm:$0xff] }
  0x21   : > { %557 = vst.msk [vmem:[%s801_s25 + $0x70] sm:$0xff] %vm542_vm0, %v436_v55  ;;  %v455_v50 = vadd.f32 %v787_v1, %v331_v39  ;;  %v335_v51 = vmul.f32 %v777_v0, %v211_v43  ;;  %v456_v53 = vadd.f32 %v787_v1, %v332_v42  ;;  %v336_v54 = vmul.f32 %v777_v0, %v212_v46  ;;  %v215_v55 = vld [vmem:[%s782_s20 + $0x148] sm:$0xff] }
  0x22   : > { %558 = vst.msk [vmem:[%s801_s25 + $0x78] sm:$0xff] %vm542_vm0, %v437_v58  ;;  %v457_v56 = vadd.f32 %v787_v1, %v333_v45  ;;  %v337_v57 = vmul.f32 %v777_v0, %v213_v49  ;;  %v216_v58 = vld [vmem:[%s782_s20 + $0x150] sm:$0xff]  ;;  %v458_v59 = vadd.f32 %v787_v1, %v334_v48  ;;  %v338_v60 = vmul.f32 %v777_v0, %v214_v52 }
  0x23   : > { %559 = vst.msk [vmem:[%s801_s25 + $0x80] sm:$0xff] %vm542_vm0, %v438_v61  ;;  %v217_v61 = vld [vmem:[%s782_s20 + $0x158] sm:$0xff]  ;;  %v459_v62 = vadd.f32 %v787_v1, %v335_v51  ;;  %v339_v63 = vmul.f32 %v777_v0, %v215_v55  ;;  %v460_v3 = vadd.f32 %v787_v1, %v336_v54  ;;  %v340_v4 = vmul.f32 %v777_v0, %v216_v58 }
  0x24   : > { %560 = vst.msk [vmem:[%s801_s25 + $0x88] sm:$0xff] %vm542_vm0, %v439_v2  ;;  %v218_v2 = vld [vmem:[%s782_s20 + $0x160] sm:$0xff]  ;;  %v461_v6 = vadd.f32 %v787_v1, %v337_v57  ;;  %v341_v7 = vmul.f32 %v777_v0, %v217_v61  ;;  %v462_v9 = vadd.f32 %v787_v1, %v338_v60 }
  0x25   : > { %561 = vst.msk [vmem:[%s801_s25 + $0x90] sm:$0xff] %vm542_vm0, %v440_v5  ;;  %v219_v5 = vld [vmem:[%s782_s20 + $0x168] sm:$0xff]  ;;  %v342_v10 = vmul.f32 %v777_v0, %v218_v2  ;;  %v463_v12 = vadd.f32 %v787_v1, %v339_v63  ;;  %v464_v15 = vadd.f32 %v787_v1, %v340_v4 }
  0x26   : > { %562 = vst.msk [vmem:[%s801_s25 + $0x98] sm:$0xff] %vm542_vm0, %v441_v8  ;;  %v220_v8 = vld [vmem:[%s782_s20 + $0x170] sm:$0xff]  ;;  %v343_v13 = vmul.f32 %v777_v0, %v219_v5  ;;  %v465_v18 = vadd.f32 %v787_v1, %v341_v7 }
  0x27   : > { %563 = vst.msk [vmem:[%s801_s25 + $0xa0] sm:$0xff] %vm542_vm0, %v442_v11  ;;  %v221_v11 = vld [vmem:[%s782_s20 + $0x178] sm:$0xff]  ;;  %v344_v16 = vmul.f32 %v777_v0, %v220_v8  ;;  %v466_v21 = vadd.f32 %v787_v1, %v342_v10 }
  0x28   : > { %564 = vst.msk [vmem:[%s801_s25 + $0xa8] sm:$0xff] %vm542_vm0, %v443_v14  ;;  %v222_v14 = vld [vmem:[%s782_s20 + $0x180] sm:$0xff]  ;;  %v345_v19 = vmul.f32 %v777_v0, %v221_v11  ;;  %v467_v24 = vadd.f32 %v787_v1, %v343_v13 }
  0x29   : > { %565 = vst.msk [vmem:[%s801_s25 + $0xb0] sm:$0xff] %vm542_vm0, %v444_v17  ;;  %v223_v17 = vld [vmem:[%s782_s20 + $0x188] sm:$0xff]  ;;  %v346_v22 = vmul.f32 %v777_v0, %v222_v14  ;;  %v468_v27 = vadd.f32 %v787_v1, %v344_v16 }
  0x2a   : > { %566 = vst.msk [vmem:[%s801_s25 + $0xb8] sm:$0xff] %vm542_vm0, %v445_v20  ;;  %v224_v20 = vld [vmem:[%s782_s20 + $0x190] sm:$0xff]  ;;  %v347_v25 = vmul.f32 %v777_v0, %v223_v17  ;;  %v469_v30 = vadd.f32 %v787_v1, %v345_v19 }
  0x2b   : > { %567 = vst.msk [vmem:[%s801_s25 + $0xc0] sm:$0xff] %vm542_vm0, %v446_v23  ;;  %v225_v23 = vld [vmem:[%s782_s20 + $0x198] sm:$0xff]  ;;  %v348_v28 = vmul.f32 %v777_v0, %v224_v20  ;;  %v470_v33 = vadd.f32 %v787_v1, %v346_v22 }
  0x2c   : > { %568 = vst.msk [vmem:[%s801_s25 + $0xc8] sm:$0xff] %vm542_vm0, %v447_v26  ;;  %v226_v26 = vld [vmem:[%s782_s20 + $0x1a0] sm:$0xff]  ;;  %v349_v31 = vmul.f32 %v777_v0, %v225_v23  ;;  %v471_v36 = vadd.f32 %v787_v1, %v347_v25 }
  0x2d   : > { %569 = vst.msk [vmem:[%s801_s25 + $0xd0] sm:$0xff] %vm542_vm0, %v448_v29  ;;  %v227_v29 = vld [vmem:[%s782_s20 + $0x1a8] sm:$0xff]  ;;  %v350_v34 = vmul.f32 %v777_v0, %v226_v26  ;;  %v472_v39 = vadd.f32 %v787_v1, %v348_v28 }
  0x2e   : > { %570 = vst.msk [vmem:[%s801_s25 + $0xd8] sm:$0xff] %vm542_vm0, %v449_v32  ;;  %v228_v32 = vld [vmem:[%s782_s20 + $0x1b0] sm:$0xff]  ;;  %v351_v37 = vmul.f32 %v777_v0, %v227_v29  ;;  %v473_v42 = vadd.f32 %v787_v1, %v349_v31 }
  0x2f   : > { %571 = vst.msk [vmem:[%s801_s25 + $0xe0] sm:$0xff] %vm542_vm0, %v450_v35  ;;  %v229_v35 = vld [vmem:[%s782_s20 + $0x1b8] sm:$0xff]  ;;  %v352_v40 = vmul.f32 %v777_v0, %v228_v32  ;;  %v474_v45 = vadd.f32 %v787_v1, %v350_v34 }
  0x30   : > { %572 = vst.msk [vmem:[%s801_s25 + $0xe8] sm:$0xff] %vm542_vm0, %v451_v38  ;;  %v230_v38 = vld [vmem:[%s782_s20 + $0x1c0] sm:$0xff]  ;;  %v353_v43 = vmul.f32 %v777_v0, %v229_v35  ;;  %v475_v48 = vadd.f32 %v787_v1, %v351_v37 }
  0x31   : > { %573 = vst.msk [vmem:[%s801_s25 + $0xf0] sm:$0xff] %vm542_vm0, %v452_v41  ;;  %v231_v41 = vld [vmem:[%s782_s20 + $0x1c8] sm:$0xff]  ;;  %v354_v46 = vmul.f32 %v777_v0, %v230_v38  ;;  %v476_v51 = vadd.f32 %v787_v1, %v352_v40 }
  0x32   : > { %574 = vst.msk [vmem:[%s801_s25 + $0xf8] sm:$0xff] %vm542_vm0, %v453_v44  ;;  %v232_v44 = vld [vmem:[%s782_s20 + $0x1d0] sm:$0xff]  ;;  %v355_v49 = vmul.f32 %v777_v0, %v231_v41  ;;  %v477_v54 = vadd.f32 %v787_v1, %v353_v43 }
  0x33   : > { %575 = vst.msk [vmem:[%s801_s25 + $0x100] sm:$0xff] %vm542_vm0, %v454_v47  ;;  %v233_v47 = vld [vmem:[%s782_s20 + $0x1d8] sm:$0xff]  ;;  %v356_v52 = vmul.f32 %v777_v0, %v232_v44  ;;  %v478_v57 = vadd.f32 %v787_v1, %v354_v46 }
  0x34   : > { %576 = vst.msk [vmem:[%s801_s25 + $0x108] sm:$0xff] %vm542_vm0, %v455_v50  ;;  %v234_v50 = vld [vmem:[%s782_s20 + $0x1e0] sm:$0xff]  ;;  %v357_v55 = vmul.f32 %v777_v0, %v233_v47  ;;  %v479_v60 = vadd.f32 %v787_v1, %v355_v49 }
  0x35   : > { %577 = vst.msk [vmem:[%s801_s25 + $0x110] sm:$0xff] %vm542_vm0, %v456_v53  ;;  %v235_v53 = vld [vmem:[%s782_s20 + $0x1e8] sm:$0xff]  ;;  %v358_v58 = vmul.f32 %v777_v0, %v234_v50  ;;  %v480_v63 = vadd.f32 %v787_v1, %v356_v52 }
  0x36   : > { %578 = vst.msk [vmem:[%s801_s25 + $0x118] sm:$0xff] %vm542_vm0, %v457_v56  ;;  %v236_v56 = vld [vmem:[%s782_s20 + $0x1f0] sm:$0xff]  ;;  %v359_v61 = vmul.f32 %v777_v0, %v235_v53  ;;  %v481_v4 = vadd.f32 %v787_v1, %v357_v55 }
  0x37   : > { %579 = vst.msk [vmem:[%s801_s25 + $0x120] sm:$0xff] %vm542_vm0, %v458_v59  ;;  %v237_v59 = vld [vmem:[%s782_s20 + $0x1f8] sm:$0xff]  ;;  %v360_v2 = vmul.f32 %v777_v0, %v236_v56  ;;  %v482_v7 = vadd.f32 %v787_v1, %v358_v58 }
  0x38   : > { %580 = vst.msk [vmem:[%s801_s25 + $0x128] sm:$0xff] %vm542_vm0, %v459_v62  ;;  %v238_v62 = vld [vmem:[%s782_s20 + $0x200] sm:$0xff]  ;;  %v361_v5 = vmul.f32 %v777_v0, %v237_v59  ;;  %v483_v10 = vadd.f32 %v787_v1, %v359_v61 }
  0x39   : > { %581 = vst.msk [vmem:[%s801_s25 + $0x130] sm:$0xff] %vm542_vm0, %v460_v3  ;;  %v239_v3 = vld [vmem:[%s782_s20 + $0x208] sm:$0xff]  ;;  %v362_v8 = vmul.f32 %v777_v0, %v238_v62  ;;  %v484_v13 = vadd.f32 %v787_v1, %v360_v2 }
  0x3a   : > { %582 = vst.msk [vmem:[%s801_s25 + $0x138] sm:$0xff] %vm542_vm0, %v461_v6  ;;  %v240_v6 = vld [vmem:[%s782_s20 + $0x210] sm:$0xff]  ;;  %v363_v11 = vmul.f32 %v777_v0, %v239_v3  ;;  %v485_v16 = vadd.f32 %v787_v1, %v361_v5 }
  0x3b   : > { %583 = vst.msk [vmem:[%s801_s25 + $0x140] sm:$0xff] %vm542_vm0, %v462_v9  ;;  %v241_v9 = vld [vmem:[%s782_s20 + $0x218] sm:$0xff]  ;;  %v364_v14 = vmul.f32 %v777_v0, %v240_v6  ;;  %v486_v19 = vadd.f32 %v787_v1, %v362_v8 }
  0x3c   : > { %584 = vst.msk [vmem:[%s801_s25 + $0x148] sm:$0xff] %vm542_vm0, %v463_v12  ;;  %v242_v12 = vld [vmem:[%s782_s20 + $0x220] sm:$0xff]  ;;  %v365_v17 = vmul.f32 %v777_v0, %v241_v9  ;;  %v487_v22 = vadd.f32 %v787_v1, %v363_v11 }
  0x3d   : > { %585 = vst.msk [vmem:[%s801_s25 + $0x150] sm:$0xff] %vm542_vm0, %v464_v15  ;;  %v243_v15 = vld [vmem:[%s782_s20 + $0x228] sm:$0xff]  ;;  %v366_v20 = vmul.f32 %v777_v0, %v242_v12  ;;  %v488_v25 = vadd.f32 %v787_v1, %v364_v14 }
  0x3e   : > { %586 = vst.msk [vmem:[%s801_s25 + $0x158] sm:$0xff] %vm542_vm0, %v465_v18  ;;  %v244_v18 = vld [vmem:[%s782_s20 + $0x230] sm:$0xff]  ;;  %v367_v23 = vmul.f32 %v777_v0, %v243_v15  ;;  %v489_v28 = vadd.f32 %v787_v1, %v365_v17 }
  0x3f   : > { %587 = vst.msk [vmem:[%s801_s25 + $0x160] sm:$0xff] %vm542_vm0, %v466_v21  ;;  %v245_v21 = vld [vmem:[%s782_s20 + $0x238] sm:$0xff]  ;;  %v368_v26 = vmul.f32 %v777_v0, %v244_v18  ;;  %v490_v31 = vadd.f32 %v787_v1, %v366_v20 }
  0x40   : > { %588 = vst.msk [vmem:[%s801_s25 + $0x168] sm:$0xff] %vm542_vm0, %v467_v24  ;;  %v246_v24 = vld [vmem:[%s782_s20 + $0x240] sm:$0xff]  ;;  %v369_v29 = vmul.f32 %v777_v0, %v245_v21  ;;  %v491_v34 = vadd.f32 %v787_v1, %v367_v23 }
  0x41   : > { %589 = vst.msk [vmem:[%s801_s25 + $0x170] sm:$0xff] %vm542_vm0, %v468_v27  ;;  %v247_v27 = vld [vmem:[%s782_s20 + $0x248] sm:$0xff]  ;;  %v370_v32 = vmul.f32 %v777_v0, %v246_v24  ;;  %v492_v37 = vadd.f32 %v787_v1, %v368_v26 }
  0x42   : > { %590 = vst.msk [vmem:[%s801_s25 + $0x178] sm:$0xff] %vm542_vm0, %v469_v30  ;;  %v248_v30 = vld [vmem:[%s782_s20 + $0x250] sm:$0xff]  ;;  %v371_v35 = vmul.f32 %v777_v0, %v247_v27  ;;  %v493_v40 = vadd.f32 %v787_v1, %v369_v29 }
  0x43   : > { %591 = vst.msk [vmem:[%s801_s25 + $0x180] sm:$0xff] %vm542_vm0, %v470_v33  ;;  %v249_v33 = vld [vmem:[%s782_s20 + $0x258] sm:$0xff]  ;;  %v372_v38 = vmul.f32 %v777_v0, %v248_v30  ;;  %v494_v43 = vadd.f32 %v787_v1, %v370_v32 }
  0x44   : > { %592 = vst.msk [vmem:[%s801_s25 + $0x188] sm:$0xff] %vm542_vm0, %v471_v36  ;;  %v250_v36 = vld [vmem:[%s782_s20 + $0x260] sm:$0xff]  ;;  %v373_v41 = vmul.f32 %v777_v0, %v249_v33  ;;  %v495_v46 = vadd.f32 %v787_v1, %v371_v35 }
  0x45   : > { %593 = vst.msk [vmem:[%s801_s25 + $0x190] sm:$0xff] %vm542_vm0, %v472_v39  ;;  %v251_v39 = vld [vmem:[%s782_s20 + $0x268] sm:$0xff]  ;;  %v374_v44 = vmul.f32 %v777_v0, %v250_v36  ;;  %v496_v49 = vadd.f32 %v787_v1, %v372_v38 }
  0x46   : > { %594 = vst.msk [vmem:[%s801_s25 + $0x198] sm:$0xff] %vm542_vm0, %v473_v42  ;;  %v252_v42 = vld [vmem:[%s782_s20 + $0x270] sm:$0xff]  ;;  %v375_v47 = vmul.f32 %v777_v0, %v251_v39  ;;  %v497_v52 = vadd.f32 %v787_v1, %v373_v41 }
  0x47   : > { %595 = vst.msk [vmem:[%s801_s25 + $0x1a0] sm:$0xff] %vm542_vm0, %v474_v45  ;;  %v253_v45 = vld [vmem:[%s782_s20 + $0x278] sm:$0xff]  ;;  %v376_v50 = vmul.f32 %v777_v0, %v252_v42  ;;  %v498_v55 = vadd.f32 %v787_v1, %v374_v44 }
  0x48   : > { %596 = vst.msk [vmem:[%s801_s25 + $0x1a8] sm:$0xff] %vm542_vm0, %v475_v48  ;;  %v254_v48 = vld [vmem:[%s782_s20 + $0x280] sm:$0xff]  ;;  %v377_v53 = vmul.f32 %v777_v0, %v253_v45  ;;  %v499_v58 = vadd.f32 %v787_v1, %v375_v47 }
  0x49   : > { %597 = vst.msk [vmem:[%s801_s25 + $0x1b0] sm:$0xff] %vm542_vm0, %v476_v51  ;;  %v255_v51 = vld [vmem:[%s782_s20 + $0x288] sm:$0xff]  ;;  %v378_v56 = vmul.f32 %v777_v0, %v254_v48  ;;  %v500_v61 = vadd.f32 %v787_v1, %v376_v50 }
  0x4a   : > { %598 = vst.msk [vmem:[%s801_s25 + $0x1b8] sm:$0xff] %vm542_vm0, %v477_v54  ;;  %v256_v54 = vld [vmem:[%s782_s20 + $0x290] sm:$0xff]  ;;  %v379_v59 = vmul.f32 %v777_v0, %v255_v51  ;;  %v501_v2 = vadd.f32 %v787_v1, %v377_v53 }
  0x4b   : > { %599 = vst.msk [vmem:[%s801_s25 + $0x1c0] sm:$0xff] %vm542_vm0, %v478_v57  ;;  %v257_v57 = vld [vmem:[%s782_s20 + $0x298] sm:$0xff]  ;;  %v380_v62 = vmul.f32 %v777_v0, %v256_v54  ;;  %v502_v5 = vadd.f32 %v787_v1, %v378_v56 }
  0x4c   : > { %600 = vst.msk [vmem:[%s801_s25 + $0x1c8] sm:$0xff] %vm542_vm0, %v479_v60  ;;  %v258_v60 = vld [vmem:[%s782_s20 + $0x2a0] sm:$0xff]  ;;  %v381_v3 = vmul.f32 %v777_v0, %v257_v57  ;;  %v503_v8 = vadd.f32 %v787_v1, %v379_v59 }
  0x4d   : > { %601 = vst.msk [vmem:[%s801_s25 + $0x1d0] sm:$0xff] %vm542_vm0, %v480_v63  ;;  %v259_v63 = vld [vmem:[%s782_s20 + $0x2a8] sm:$0xff]  ;;  %v382_v6 = vmul.f32 %v777_v0, %v258_v60  ;;  %v504_v11 = vadd.f32 %v787_v1, %v380_v62 }
  0x4e   : > { %602 = vst.msk [vmem:[%s801_s25 + $0x1d8] sm:$0xff] %vm542_vm0, %v481_v4  ;;  %v260_v4 = vld [vmem:[%s782_s20 + $0x2b0] sm:$0xff]  ;;  %v383_v9 = vmul.f32 %v777_v0, %v259_v63  ;;  %v505_v14 = vadd.f32 %v787_v1, %v381_v3 }
  0x4f   : > { %603 = vst.msk [vmem:[%s801_s25 + $0x1e0] sm:$0xff] %vm542_vm0, %v482_v7  ;;  %v261_v7 = vld [vmem:[%s782_s20 + $0x2b8] sm:$0xff]  ;;  %v384_v12 = vmul.f32 %v777_v0, %v260_v4  ;;  %v506_v17 = vadd.f32 %v787_v1, %v382_v6 }
  0x50   : > { %604 = vst.msk [vmem:[%s801_s25 + $0x1e8] sm:$0xff] %vm542_vm0, %v483_v10  ;;  %v262_v10 = vld [vmem:[%s782_s20 + $0x2c0] sm:$0xff]  ;;  %v385_v15 = vmul.f32 %v777_v0, %v261_v7  ;;  %v507_v20 = vadd.f32 %v787_v1, %v383_v9 }
  0x51   : > { %605 = vst.msk [vmem:[%s801_s25 + $0x1f0] sm:$0xff] %vm542_vm0, %v484_v13  ;;  %v263_v13 = vld [vmem:[%s782_s20 + $0x2c8] sm:$0xff]  ;;  %v386_v18 = vmul.f32 %v777_v0, %v262_v10  ;;  %v508_v23 = vadd.f32 %v787_v1, %v384_v12 }
  0x52   : > { %606 = vst.msk [vmem:[%s801_s25 + $0x1f8] sm:$0xff] %vm542_vm0, %v485_v16  ;;  %v264_v16 = vld [vmem:[%s782_s20 + $0x2d0] sm:$0xff]  ;;  %v387_v21 = vmul.f32 %v777_v0, %v263_v13  ;;  %v509_v26 = vadd.f32 %v787_v1, %v385_v15 }
  0x53   : > { %607 = vst.msk [vmem:[%s801_s25 + $0x200] sm:$0xff] %vm542_vm0, %v486_v19  ;;  %v265_v19 = vld [vmem:[%s782_s20 + $0x2d8] sm:$0xff]  ;;  %v388_v24 = vmul.f32 %v777_v0, %v264_v16  ;;  %v510_v29 = vadd.f32 %v787_v1, %v386_v18 }
  0x54   : > { %608 = vst.msk [vmem:[%s801_s25 + $0x208] sm:$0xff] %vm542_vm0, %v487_v22  ;;  %v266_v22 = vld [vmem:[%s782_s20 + $0x2e0] sm:$0xff]  ;;  %v389_v27 = vmul.f32 %v777_v0, %v265_v19  ;;  %v511_v32 = vadd.f32 %v787_v1, %v387_v21 }
  0x55   : > { %609 = vst.msk [vmem:[%s801_s25 + $0x210] sm:$0xff] %vm542_vm0, %v488_v25  ;;  %v267_v25 = vld [vmem:[%s782_s20 + $0x2e8] sm:$0xff]  ;;  %v390_v30 = vmul.f32 %v777_v0, %v266_v22  ;;  %v512_v35 = vadd.f32 %v787_v1, %v388_v24 }
  0x56   : > { %610 = vst.msk [vmem:[%s801_s25 + $0x218] sm:$0xff] %vm542_vm0, %v489_v28  ;;  %v268_v28 = vld [vmem:[%s782_s20 + $0x2f0] sm:$0xff]  ;;  %v391_v33 = vmul.f32 %v777_v0, %v267_v25  ;;  %v513_v38 = vadd.f32 %v787_v1, %v389_v27 }
  0x57   : > { %611 = vst.msk [vmem:[%s801_s25 + $0x220] sm:$0xff] %vm542_vm0, %v490_v31  ;;  %v269_v31 = vld [vmem:[%s782_s20 + $0x2f8] sm:$0xff]  ;;  %v392_v36 = vmul.f32 %v777_v0, %v268_v28  ;;  %v514_v41 = vadd.f32 %v787_v1, %v390_v30 }
  0x58   : > { %612 = vst.msk [vmem:[%s801_s25 + $0x228] sm:$0xff] %vm542_vm0, %v491_v34  ;;  %v270_v34 = vld [vmem:[%s782_s20 + $0x300] sm:$0xff]  ;;  %v393_v39 = vmul.f32 %v777_v0, %v269_v31  ;;  %v515_v44 = vadd.f32 %v787_v1, %v391_v33 }
  0x59   : > { %613 = vst.msk [vmem:[%s801_s25 + $0x230] sm:$0xff] %vm542_vm0, %v492_v37  ;;  %v271_v37 = vld [vmem:[%s782_s20 + $0x308] sm:$0xff]  ;;  %v394_v42 = vmul.f32 %v777_v0, %v270_v34  ;;  %v516_v47 = vadd.f32 %v787_v1, %v392_v36 }
  0x5a   : > { %614 = vst.msk [vmem:[%s801_s25 + $0x238] sm:$0xff] %vm542_vm0, %v493_v40  ;;  %v272_v40 = vld [vmem:[%s782_s20 + $0x310] sm:$0xff]  ;;  %v395_v45 = vmul.f32 %v777_v0, %v271_v37  ;;  %v517_v50 = vadd.f32 %v787_v1, %v393_v39 }
  0x5b   : > { %615 = vst.msk [vmem:[%s801_s25 + $0x240] sm:$0xff] %vm542_vm0, %v494_v43  ;;  %v273_v43 = vld [vmem:[%s782_s20 + $0x318] sm:$0xff]  ;;  %v396_v48 = vmul.f32 %v777_v0, %v272_v40  ;;  %v518_v53 = vadd.f32 %v787_v1, %v394_v42 }
  0x5c   : > { %616 = vst.msk [vmem:[%s801_s25 + $0x248] sm:$0xff] %vm542_vm0, %v495_v46  ;;  %v274_v46 = vld [vmem:[%s782_s20 + $0x320] sm:$0xff]  ;;  %v397_v51 = vmul.f32 %v777_v0, %v273_v43  ;;  %v519_v56 = vadd.f32 %v787_v1, %v395_v45 }
  0x5d   : > { %617 = vst.msk [vmem:[%s801_s25 + $0x250] sm:$0xff] %vm542_vm0, %v496_v49  ;;  %v275_v49 = vld [vmem:[%s782_s20 + $0x328] sm:$0xff]  ;;  %v398_v54 = vmul.f32 %v777_v0, %v274_v46  ;;  %v520_v59 = vadd.f32 %v787_v1, %v396_v48 }
  0x5e   : > { %618 = vst.msk [vmem:[%s801_s25 + $0x258] sm:$0xff] %vm542_vm0, %v497_v52  ;;  %v276_v52 = vld [vmem:[%s782_s20 + $0x330] sm:$0xff]  ;;  %v399_v57 = vmul.f32 %v777_v0, %v275_v49  ;;  %v521_v62 = vadd.f32 %v787_v1, %v397_v51 }
  0x5f   : > { %619 = vst.msk [vmem:[%s801_s25 + $0x260] sm:$0xff] %vm542_vm0, %v498_v55  ;;  %v277_v55 = vld [vmem:[%s782_s20 + $0x338] sm:$0xff]  ;;  %v400_v60 = vmul.f32 %v777_v0, %v276_v52  ;;  %v522_v3 = vadd.f32 %v787_v1, %v398_v54 }
  0x60   : > { %620 = vst.msk [vmem:[%s801_s25 + $0x268] sm:$0xff] %vm542_vm0, %v499_v58  ;;  %v278_v58 = vld [vmem:[%s782_s20 + $0x340] sm:$0xff]  ;;  %v401_v63 = vmul.f32 %v777_v0, %v277_v55  ;;  %v523_v6 = vadd.f32 %v787_v1, %v399_v57 }
  0x61   : > { %621 = vst.msk [vmem:[%s801_s25 + $0x270] sm:$0xff] %vm542_vm0, %v500_v61  ;;  %v279_v61 = vld [vmem:[%s782_s20 + $0x348] sm:$0xff]  ;;  %v402_v4 = vmul.f32 %v777_v0, %v278_v58  ;;  %v524_v9 = vadd.f32 %v787_v1, %v400_v60 }
  0x62   : > { %622 = vst.msk [vmem:[%s801_s25 + $0x278] sm:$0xff] %vm542_vm0, %v501_v2  ;;  %v280_v2 = vld [vmem:[%s782_s20 + $0x350] sm:$0xff]  ;;  %v403_v7 = vmul.f32 %v777_v0, %v279_v61  ;;  %v525_v12 = vadd.f32 %v787_v1, %v401_v63 }
  0x63   : > { %623 = vst.msk [vmem:[%s801_s25 + $0x280] sm:$0xff] %vm542_vm0, %v502_v5  ;;  %v281_v5 = vld [vmem:[%s782_s20 + $0x358] sm:$0xff]  ;;  %v404_v10 = vmul.f32 %v777_v0, %v280_v2  ;;  %v526_v15 = vadd.f32 %v787_v1, %v402_v4 }
  0x64   : > { %624 = vst.msk [vmem:[%s801_s25 + $0x288] sm:$0xff] %vm542_vm0, %v503_v8  ;;  %v282_v8 = vld [vmem:[%s782_s20 + $0x360] sm:$0xff]  ;;  %v405_v13 = vmul.f32 %v777_v0, %v281_v5  ;;  %v527_v18 = vadd.f32 %v787_v1, %v403_v7 }
  0x65   : > { %625 = vst.msk [vmem:[%s801_s25 + $0x290] sm:$0xff] %vm542_vm0, %v504_v11  ;;  %v283_v11 = vld [vmem:[%s782_s20 + $0x368] sm:$0xff]  ;;  %v406_v16 = vmul.f32 %v777_v0, %v282_v8  ;;  %v528_v21 = vadd.f32 %v787_v1, %v404_v10 }
  0x66   : > { %626 = vst.msk [vmem:[%s801_s25 + $0x298] sm:$0xff] %vm542_vm0, %v505_v14  ;;  %v284_v14 = vld [vmem:[%s782_s20 + $0x370] sm:$0xff]  ;;  %v407_v19 = vmul.f32 %v777_v0, %v283_v11  ;;  %v529_v24 = vadd.f32 %v787_v1, %v405_v13 }
  0x67   : > { %627 = vst.msk [vmem:[%s801_s25 + $0x2a0] sm:$0xff] %vm542_vm0, %v506_v17  ;;  %v285_v17 = vld [vmem:[%s782_s20 + $0x378] sm:$0xff]  ;;  %v408_v22 = vmul.f32 %v777_v0, %v284_v14  ;;  %v530_v27 = vadd.f32 %v787_v1, %v406_v16 }
  0x68   : > { %628 = vst.msk [vmem:[%s801_s25 + $0x2a8] sm:$0xff] %vm542_vm0, %v507_v20  ;;  %v286_v20 = vld [vmem:[%s782_s20 + $0x380] sm:$0xff]  ;;  %v409_v25 = vmul.f32 %v777_v0, %v285_v17  ;;  %v531_v30 = vadd.f32 %v787_v1, %v407_v19 }
  0x69   : > { %629 = vst.msk [vmem:[%s801_s25 + $0x2b0] sm:$0xff] %vm542_vm0, %v508_v23  ;;  %v287_v23 = vld [vmem:[%s782_s20 + $0x388] sm:$0xff]  ;;  %v410_v28 = vmul.f32 %v777_v0, %v286_v20  ;;  %v532_v33 = vadd.f32 %v787_v1, %v408_v22 }
  0x6a   : > { %630 = vst.msk [vmem:[%s801_s25 + $0x2b8] sm:$0xff] %vm542_vm0, %v509_v26  ;;  %v288_v26 = vld [vmem:[%s782_s20 + $0x390] sm:$0xff]  ;;  %v411_v31 = vmul.f32 %v777_v0, %v287_v23  ;;  %v533_v36 = vadd.f32 %v787_v1, %v409_v25 }
  0x6b   : > { %631 = vst.msk [vmem:[%s801_s25 + $0x2c0] sm:$0xff] %vm542_vm0, %v510_v29  ;;  %v289_v29 = vld [vmem:[%s782_s20 + $0x398] sm:$0xff]  ;;  %v412_v34 = vmul.f32 %v777_v0, %v288_v26  ;;  %v534_v39 = vadd.f32 %v787_v1, %v410_v28 }
  0x6c   : > { %632 = vst.msk [vmem:[%s801_s25 + $0x2c8] sm:$0xff] %vm542_vm0, %v511_v32  ;;  %v290_v32 = vld [vmem:[%s782_s20 + $0x3a0] sm:$0xff]  ;;  %v413_v37 = vmul.f32 %v777_v0, %v289_v29  ;;  %v535_v42 = vadd.f32 %v787_v1, %v411_v31 }
  0x6d   : > { %633 = vst.msk [vmem:[%s801_s25 + $0x2d0] sm:$0xff] %vm542_vm0, %v512_v35  ;;  %v291_v35 = vld [vmem:[%s782_s20 + $0x3a8] sm:$0xff]  ;;  %v414_v40 = vmul.f32 %v777_v0, %v290_v32 }
  0x6e   : > { %634 = vst.msk [vmem:[%s801_s25 + $0x2d8] sm:$0xff] %vm542_vm0, %v513_v38  ;;  %v292_v38 = vld [vmem:[%s782_s20 + $0x3b0] sm:$0xff]  ;;  %v415_v43 = vmul.f32 %v777_v0, %v291_v35  ;;  %v537_v46 = vadd.f32 %v787_v1, %v413_v37 }
  0x6f   : > { %635 = vst.msk [vmem:[%s801_s25 + $0x2e0] sm:$0xff] %vm542_vm0, %v514_v41  ;;  %v293_v41 = vld [vmem:[%s782_s20 + $0x3b8] sm:$0xff]  ;;  %v416_v45 = vmul.f32 %v777_v0, %v292_v38  ;;  %v538_v48 = vadd.f32 %v787_v1, %v414_v40 }
  0x70   : > { %636 = vst.msk [vmem:[%s801_s25 + $0x2e8] sm:$0xff] %vm542_vm0, %v515_v44  ;;  %v536_v44 = vadd.f32 %v787_v1, %v412_v34  ;;  %v539_v49 = vadd.f32 %v787_v1, %v415_v43 }
  0x71   : > { %637 = vst.msk [vmem:[%s801_s25 + $0x2f0] sm:$0xff] %vm542_vm0, %v516_v47  ;;  %v417_v47 = vmul.f32 %v777_v0, %v293_v41 }
  0x72   : > { %638 = vst.msk [vmem:[%s801_s25 + $0x2f8] sm:$0xff] %vm542_vm0, %v517_v50  ;;  %v540_v50 = vadd.f32 %v787_v1, %v416_v45 }
  0x73   : > { %639 = vst.msk [vmem:[%s801_s25 + $0x300] sm:$0xff] %vm542_vm0, %v518_v53  ;;  %v541_v51 = vadd.f32 %v787_v1, %v417_v47 }
  0x74   : > { %640 = vst.msk [vmem:[%s801_s25 + $0x308] sm:$0xff] %vm542_vm0, %v519_v56 }
  0x75   : > { %641 = vst.msk [vmem:[%s801_s25 + $0x310] sm:$0xff] %vm542_vm0, %v520_v59 }
  0x76   : > { %642 = vst.msk [vmem:[%s801_s25 + $0x318] sm:$0xff] %vm542_vm0, %v521_v62 }
  0x77   : > { %643 = vst.msk [vmem:[%s801_s25 + $0x320] sm:$0xff] %vm542_vm0, %v522_v3 }
  0x78   : > { %644 = vst.msk [vmem:[%s801_s25 + $0x328] sm:$0xff] %vm542_vm0, %v523_v6 }
  0x79   : > { %645 = vst.msk [vmem:[%s801_s25 + $0x330] sm:$0xff] %vm542_vm0, %v524_v9 }
  0x7a   : > { %646 = vst.msk [vmem:[%s801_s25 + $0x338] sm:$0xff] %vm542_vm0, %v525_v12 }
  0x7b   : > { %647 = vst.msk [vmem:[%s801_s25 + $0x340] sm:$0xff] %vm542_vm0, %v526_v15 }
  0x7c   : > { %648 = vst.msk [vmem:[%s801_s25 + $0x348] sm:$0xff] %vm542_vm0, %v527_v18 }
  0x7d   : > { %649 = vst.msk [vmem:[%s801_s25 + $0x350] sm:$0xff] %vm542_vm0, %v528_v21 }
  0x7e   : > { %650 = vst.msk [vmem:[%s801_s25 + $0x358] sm:$0xff] %vm542_vm0, %v529_v24 }
  0x7f   : > { %651 = vst.msk [vmem:[%s801_s25 + $0x360] sm:$0xff] %vm542_vm0, %v530_v27 }
  0x80   : > { %652 = vst.msk [vmem:[%s801_s25 + $0x368] sm:$0xff] %vm542_vm0, %v531_v30 }
  0x81   : > { %653 = vst.msk [vmem:[%s801_s25 + $0x370] sm:$0xff] %vm542_vm0, %v532_v33 }
  0x82   : > { %654 = vst.msk [vmem:[%s801_s25 + $0x378] sm:$0xff] %vm542_vm0, %v533_v36 }
  0x83   : > { %655 = vst.msk [vmem:[%s801_s25 + $0x380] sm:$0xff] %vm542_vm0, %v534_v39 }
  0x84   : > { %656 = vst.msk [vmem:[%s801_s25 + $0x388] sm:$0xff] %vm542_vm0, %v535_v42 }
  0x85   : > { %657 = vst.msk [vmem:[%s801_s25 + $0x390] sm:$0xff] %vm542_vm0, %v536_v44 }
  0x86   : > { %658 = vst.msk [vmem:[%s801_s25 + $0x398] sm:$0xff] %vm542_vm0, %v537_v46 }
  0x87   : > { %659 = vst.msk [vmem:[%s801_s25 + $0x3a0] sm:$0xff] %vm542_vm0, %v538_v48 }
  0x88   : > { %660 = vst.msk [vmem:[%s801_s25 + $0x3a8] sm:$0xff] %vm542_vm0, %v539_v49 }
  0x89   : > { %661 = vst.msk [vmem:[%s801_s25 + $0x3b0] sm:$0xff] %vm542_vm0, %v540_v50 }
  0x8a   : > { %662 = vst.msk [vmem:[%s801_s25 + $0x3b8] sm:$0xff] %vm542_vm0, %v541_v51 }
  0x8b PF: > { %s13_s12 = sadd.s32 1, %s744_s12  }
  0x8c   : > { %p10_p4 = scmp.ge.s32.totalorder %s13_s12, 8  }
  0x8e   :  { %12 = sbr.rel (!%p10_p4) target bundleno = 1 (0x1), region = 62 }

</bundles_post_ra>
